<compile_context>
chip_gen: v7x
topology: tpu7x:2x2x1
jax: 0.10.0
libtpu: 0.0.40
codegen_flags: <defaults>
</compile_context>

<pallas_src>
import jax
import jax.numpy as jnp
import numpy as np
from jax import lax
from jax.experimental import pallas as pl
from jax.experimental.pallas import tpu as pltpu

NUM_KMERS = 18
HIDDEN = 150
MAX_TN = 8192   # instance-kernel lane tile (reads)   -- sweepable 4096..8192
MAX_TS = 8192   # site-kernel lane tile (sites)       -- sweepable 4096..16384


def _round_up(a, b):
    return (a + b - 1) // b * b


def _pick_tile(count, max_tile, target_steps=4):
    """Pick a lane tile: as big as possible (amortize ~0.35us/step overhead) but
    keeping >=target_steps grid steps when the data allows it (v7x megacore)."""
    lanes = _round_up(max(count, 1), 128)
    tile = _round_up(-(-lanes // target_steps), 128)
    tile = max(128, min(tile, max_tile))
    padded = _round_up(lanes, tile)
    return tile, padded


def _vmem_limit_bytes():
    kind = ""
    try:
        kind = jax.devices()[0].device_kind.lower()
    except Exception:
        pass
    if ("v5" in kind) or ("v6" in kind):
        return 96 * 1024 * 1024    # 128 MiB physical on v5e/v6e
    return 48 * 1024 * 1024        # safe default; v7x has only 64 MiB per TC


# --------------------------------------------------------------------------
# Sorting network (Knuth merge-exchange / Batcher; valid for any n).
# For n=8 this emits 19 compare-exchanges.
# --------------------------------------------------------------------------
def _make_sort_pairs(n):
    pairs = []
    if n < 2:
        return pairs
    t = 1
    while (1 << t) < n:
        t += 1
    p = 1 << (t - 1)
    while p > 0:
        q = 1 << (t - 1)
        r = 0
        d = p
        while True:
            for i in range(n - d):
                if (i & p) == r:
                    pairs.append((i, i + d))
            if q == p:
                break
            d = q - p
            q >>= 1
            r = p
        p >>= 1
    return pairs


def _group_stats(slabs):
    """mean / unbiased var / min / median(lower-middle) / max across a list of
    equal-shaped slabs.  One pass for sum & sum-of-squares, sorting network for
    the order statistics (min/max/median read off the sorted slabs)."""
    g = len(slabs)
    total = slabs[0]
    sumsq = slabs[0] * slabs[0]
    for v in slabs[1:]:
        total = total + v
        sumsq = sumsq + v * v
    mean = total * (1.0 / g)
    # torch.var default is unbiased (G-1): NaN for G==1, exactly as torch.
    var = (sumsq - total * mean) / jnp.float32(g - 1)

    svals = list(slabs)
    for (i, j) in _make_sort_pairs(g):
        lo = jnp.minimum(svals[i], svals[j])
        hi = jnp.maximum(svals[i], svals[j])
        svals[i], svals[j] = lo, hi
    vmin = svals[0]
    vmax = svals[g - 1]
    med = svals[(g - 1) // 2]        # torch.median = lower middle value
    return mean, var, vmin, med, vmax


# --------------------------------------------------------------------------
# Kernel 1: per-read MLP, transposed (lane-dense) orientation, single fused
# linear1 matmul.  The combined [dcp+18, TN] operand (x rows + one-hot rows) is
# assembled in a VMEM scratch with aligned static-slice stores; b1 is folded
# into the kmer weight columns on the host.
# --------------------------------------------------------------------------
def instance_kernel(xt_ref, kmer_ref, wc_ref, w2_ref, b2_ref, ht_ref, comb_ref):
    dcp = xt_ref.shape[0]
    tn = xt_ref.shape[1]

    comb_ref[0:dcp, :] = xt_ref[...]                         # x features (+ zero pad rows)

    kmer = kmer_ref[...]                                     # [1, TN] int32
    iota = lax.broadcasted_iota(jnp.int32, (NUM_KMERS, tn), 0)
    comb_ref[dcp:dcp + NUM_KMERS, :] = (iota == kmer).astype(jnp.float32)

    # single MXU matmul: relu(Wc @ [x ; onehot])  (b1 already folded into Wc)
    h1 = jnp.dot(wc_ref[...], comb_ref[...], preferred_element_type=jnp.float32)
    h1 = jnp.maximum(h1, 0.0)                                # relu(linear1) -> [150, TN]

    w2 = w2_ref[...]                                         # [150, p]
    p = w2.shape[1]
    if p == 1:
        # 1-column matmul -> VPU multiply + sublane reduce (skip MXU).
        h2 = jnp.sum(h1 * w2, axis=0, keepdims=True)         # [1, TN]
    else:
        h2 = lax.dot_general(w2, h1, (((0,), (0,)), ((), ())),
                             preferred_element_type=jnp.float32)  # [p, TN]
    ht_ref[...] = jnp.maximum(h2 + b2_ref[...], 0.0)         # relu(linear2) -> [p, TN]


# --------------------------------------------------------------------------
# Kernel 2: per-site aggregation + site MLP, sites on lanes.
#   input block: [G, p, TS]  (G reads per site on the leading slab axis)
#   stats: one-pass mean/var + sorting-network min/median/max (all VPU),
#   then MXU matmul for linear3 and VPU reduce for the 1-output linear4.
# --------------------------------------------------------------------------
def site_kernel(grp_ref, w3t_ref, b3_ref, w4_ref, b4_ref, out_ref):
    v = grp_ref[...]                                         # [G, p, TS]
    g = v.shape[0]
    mean, var, vmin, med, vmax = _group_stats([v[i] for i in range(g)])

    # stat-major, feature-minor == torch .view(-1, 5*p); rows index stat*p + f.
    agg = jnp.concatenate([mean, var, vmin, med, vmax], axis=0)   # [5p, TS]

    h3 = jnp.dot(w3t_ref[...], agg, preferred_element_type=jnp.float32) + b3_ref[...]
    h3 = jnp.maximum(h3, 0.0)                                # [150, TS]

    # linear4 has a single output -> VPU multiply + sublane reduce.
    logits = jnp.sum(h3 * w4_ref[...], axis=0, keepdims=True) + b4_ref[...]  # [1, TS]

    # numerically stable sigmoid (exp on EUP, no inf intermediates)
    z = jnp.exp(-jnp.abs(logits))
    out_ref[...] = jnp.where(logits >= 0.0, 1.0 / (1.0 + z), z / (1.0 + z))


# --------------------------------------------------------------------------
# Wrapper
# --------------------------------------------------------------------------
def multi_instance_forward(x, kmer, indices, params):
    n, dim_cov = x.shape
    s, g = indices.shape
    p = params["W2"].shape[1]
    dcp = _round_up(dim_cov, 8)                 # sublane-aligned x-row block
    vmem_limit = _vmem_limit_bytes()

    # ---------------- per-read MLP ----------------
    tn, n_pad = _pick_tile(n, MAX_TN)
    xt = jnp.zeros((dcp, n_pad), jnp.float32).at[:dim_cov, :n].set(x.T.astype(jnp.float32))
    km = jnp.zeros((1, n_pad), jnp.int32).at[:, :n].set(kmer.astype(jnp.int32)[None, :])

    # Fused linear1 weight [150, dcp+18]: x columns | zero pad | kmer columns
    # (embedding folded: E @ W1_emb) with b1 folded into every kmer column
    # (the one-hot sums to exactly 1).
    w1xt = params["W1"][:dim_cov].T                                   # [150, dim_cov]
    w1kt = (params["E"] @ params["W1"][dim_cov:]).T + params["b1"][:, None]  # [150, 18]
    wc = jnp.zeros((HIDDEN, dcp + NUM_KMERS), jnp.float32)
    wc = wc.at[:, :dim_cov].set(w1xt).at[:, dcp:].set(w1kt)
    w2 = params["W2"]                                                 # [150, p]
    b2 = params["b2"].reshape(p, 1)

    ht = pl.pallas_call(
        instance_kernel,
        grid=(n_pad // tn,),
        in_specs=[
            pl.BlockSpec((dcp, tn), lambda i: (0, i)),
            pl.BlockSpec((1, tn), lambda i: (0, i)),
            pl.BlockSpec((HIDDEN, dcp + NUM_KMERS), lambda i: (0, 0)),
            pl.BlockSpec((HIDDEN, p), lambda i: (0, 0)),
            pl.BlockSpec((p, 1), lambda i: (0, 0)),
        ],
        out_specs=pl.BlockSpec((p, tn), lambda i: (0, i)),
        out_shape=jax.ShapeDtypeStruct((p, n_pad), jnp.float32),
        scratch_shapes=[pltpu.VMEM((dcp + NUM_KMERS, tn), jnp.float32)],
        compiler_params=pltpu.CompilerParams(
            dimension_semantics=("parallel",),
            vmem_limit_bytes=vmem_limit),
    )(xt, km, wc, w2, b2)                                             # [p, n_pad]

    # ---------------- glue: gather reads into sites ----------------
    # Pad the index table first, gather once at padded size (no double
    # materialization of `grouped`); only touches the tiny lane-dense [p, N].
    ts, s_pad = _pick_tile(s, MAX_TS)
    idx = jnp.zeros((s_pad, g), jnp.int32).at[:s].set(indices.astype(jnp.int32))
    grouped = jnp.transpose(ht[:, idx.T], (1, 0, 2))                  # [G, p, s_pad]

    w3t = params["W3"].T                                              # [150, 5p]
    b3 = params["b3"].reshape(HIDDEN, 1)
    w4 = params["W4"]                                                 # [150, 1]
    b4 = params["b4"].reshape(1, 1)

    out_t = pl.pallas_call(
        site_kernel,
        grid=(s_pad // ts,),
        in_specs=[
            pl.BlockSpec((g, p, ts), lambda i: (0, 0, i)),
            pl.BlockSpec((HIDDEN, 5 * p), lambda i: (0, 0)),
            pl.BlockSpec((HIDDEN, 1), lambda i: (0, 0)),
            pl.BlockSpec((HIDDEN, 1), lambda i: (0, 0)),
            pl.BlockSpec((1, 1), lambda i: (0, 0)),
        ],
        out_specs=pl.BlockSpec((1, ts), lambda i: (0, i)),
        out_shape=jax.ShapeDtypeStruct((1, s_pad), jnp.float32),
        compiler_params=pltpu.CompilerParams(
            dimension_semantics=("parallel",),
            vmem_limit_bytes=vmem_limit),
    )(grouped, w3t, b3, w4, b4)                                       # [1, s_pad]

    return out_t[0, :s].reshape(s, 1)


# --------------------------------------------------------------------------
# Deterministic parameter init (shapes from the module __init__)
# --------------------------------------------------------------------------
def init_params(key, dim_cov, p=1, embedding_dim=2):
    ks = jax.random.split(key, 9)
    sc = 0.1
    return {
        "E":  jax.random.normal(ks[0], (NUM_KMERS, embedding_dim), jnp.float32) * sc,
        "W1": jax.random.normal(ks[1], (dim_cov + embedding_dim, HIDDEN), jnp.float32) * sc,
        "b1": jax.random.normal(ks[2], (HIDDEN,), jnp.float32) * sc,
        "W2": jax.random.normal(ks[3], (HIDDEN, p), jnp.float32) * sc,
        "b2": jax.random.normal(ks[4], (p,), jnp.float32) * sc,
        "W3": jax.random.normal(ks[5], (5 * p, HIDDEN), jnp.float32) * sc,
        "b3": jax.random.normal(ks[6], (HIDDEN,), jnp.float32) * sc,
        "W4": jax.random.normal(ks[7], (HIDDEN, 1), jnp.float32) * sc,
        "b4": jax.random.normal(ks[8], (1,), jnp.float32) * sc,
    }


# --------------------------------------------------------------------------
# Pure-JAX reference (matches the PyTorch forward semantics exactly)
# --------------------------------------------------------------------------
def reference_forward(x, kmer, indices, params):
    s, g = indices.shape
    p = params["W2"].shape[1]
    emb = params["E"][kmer]
    feat = jnp.concatenate([x, emb], axis=1)
    h1 = jax.nn.relu(feat @ params["W1"] + params["b1"])
    h2 = jax.nn.relu(h1 @ params["W2"] + params["b2"])        # [N, p]
    groups = h2[indices]                                      # [S, G, p]
    mean = groups.mean(axis=1)
    var = groups.var(axis=1, ddof=1)                          # torch.var (unbiased)
    vmin = groups.min(axis=1)
    vmax = groups.max(axis=1)
    med = jnp.sort(groups, axis=1)[:, (g - 1) // 2, :]        # torch.median (lower middle)
    agg = jnp.stack([mean, var, vmin, med, vmax], axis=1).reshape(s, 5 * p)
    h3 = jax.nn.relu(agg @ params["W3"] + params["b3"])
    return jax.nn.sigmoid(h3 @ params["W4"] + params["b4"])


if __name__ == "__main__":
    key = jax.random.PRNGKey(0)
    k_par, k_x, k_kmer, k_idx = jax.random.split(key, 4)

    dim_cov, p, emb_dim = 6, 1, 2
    n_sites, reads_per_site = 24, 8
    n_reads = n_sites * reads_per_site

    params = init_params(k_par, dim_cov, p=p, embedding_dim=emb_dim)
    x = jax.random.normal(k_x, (n_reads, dim_cov), jnp.float32)
    kmer = jax.random.randint(k_kmer, (n_reads,), 0, NUM_KMERS, jnp.int32)
    indices = jax.random.permutation(k_idx, n_reads).reshape(n_sites, reads_per_site)

    fwd = jax.jit(multi_instance_forward)
    out = jax.block_until_ready(fwd(x, kmer, indices, params))

    ref = reference_forward(x, kmer, indices, params)
    np.testing.assert_allclose(np.asarray(out), np.asarray(ref), rtol=1e-4, atol=5e-5)

    print("KERNEL_OK")
</pallas_src>

<mosaic_0001>
module attributes {stable_mosaic.version = 11 : i64} {
  func.func @instance_kernel(%arg0: i32, %arg1: memref<8x128xf32, #tpu.memory_space<vmem>>, %arg2: memref<1x128xi32, #tpu.memory_space<vmem>>, %arg3: memref<150x26xf32, #tpu.memory_space<vmem>>, %arg4: memref<150x1xf32, #tpu.memory_space<vmem>>, %arg5: memref<1x1xf32, #tpu.memory_space<vmem>>, %arg6: memref<1x128xf32, #tpu.memory_space<vmem>>, %arg7: memref<26x128xf32, #tpu.memory_space<vmem>>) attributes {dimension_semantics = [#tpu.dimension_semantics<parallel>], iteration_bounds = array<i64: 2>, scalar_prefetch = 0 : i64, scratch_operands = 1 : i64, tpu.core_type = #tpu.core_type<tc>, window_params = [{transform_indices = @transform_0, window_bounds = array<i64: 8, 128>}, {transform_indices = @transform_1, window_bounds = array<i64: 1, 128>}, {pipeline_mode = #tpu.pipeline_mode<synchronous>, transform_indices = @transform_2, window_bounds = array<i64: 150, 26>}, {pipeline_mode = #tpu.pipeline_mode<synchronous>, transform_indices = @transform_3, window_bounds = array<i64: 150, 1>}, {pipeline_mode = #tpu.pipeline_mode<synchronous>, transform_indices = @transform_4, window_bounds = array<i64: 1, 1>}, {transform_indices = @transform_5, window_bounds = array<i64: 1, 128>}]} {
    %c0 = arith.constant 0 : index
    %c0_0 = arith.constant 0 : index
    %0 = vector.load %arg1[%c0, %c0_0] : memref<8x128xf32, #tpu.memory_space<vmem>>, vector<8x128xf32>
    %c0_1 = arith.constant 0 : index
    %c0_2 = arith.constant 0 : index
    %1 = vector.load %arg7[%c0_1, %c0_2] : memref<26x128xf32, #tpu.memory_space<vmem>>, vector<8x128xf32>
    tpu.vector_store %arg7[%c0_1, %c0_2], %0 {strides = array<i32>} : memref<26x128xf32, #tpu.memory_space<vmem>>, vector<8x128xf32>,
    %c0_3 = arith.constant 0 : index
    %c0_4 = arith.constant 0 : index
    %2 = vector.load %arg2[%c0_3, %c0_4] : memref<1x128xi32, #tpu.memory_space<vmem>>, vector<1x128xi32>
    %3 = tpu.iota {dimensions = array<i32: 0>} : vector<18x128xi32>
    %4 = vector.broadcast %2 : vector<1x128xi32> to vector<18x128xi32>
    %5 = arith.cmpi eq, %3, %4 : vector<18x128xi32>
    %6 = arith.extui %5 : vector<18x128xi1> to vector<18x128xi32>
    %7 = arith.sitofp %6 : vector<18x128xi32> to vector<18x128xf32>
    %c8 = arith.constant 8 : index
    %c0_5 = arith.constant 0 : index
    %8 = vector.load %arg7[%c8, %c0_5] : memref<26x128xf32, #tpu.memory_space<vmem>>, vector<18x128xf32>
    tpu.vector_store %arg7[%c8, %c0_5], %7 {strides = array<i32>} : memref<26x128xf32, #tpu.memory_space<vmem>>, vector<18x128xf32>,
    %c0_6 = arith.constant 0 : index
    %c0_7 = arith.constant 0 : index
    %9 = vector.load %arg3[%c0_6, %c0_7] : memref<150x26xf32, #tpu.memory_space<vmem>>, vector<150x26xf32>
    %c0_8 = arith.constant 0 : index
    %c0_9 = arith.constant 0 : index
    %10 = vector.load %arg7[%c0_8, %c0_9] : memref<26x128xf32, #tpu.memory_space<vmem>>, vector<26x128xf32>
    %cst = arith.constant dense<0.000000e+00> : vector<150x128xf32>
    %11 = tpu.matmul %9, %10, %cst {dimension_numbers = #tpu.dot_dimension_numbers<[1], [0], [0], [1], [0, 0, 1, 1], [], []>} : vector<150x26xf32>, vector<26x128xf32>, vector<150x128xf32> -> vector<150x128xf32>
    %cst_10 = arith.constant 0.000000e+00 : f32
    %12 = vector.broadcast %cst_10 : f32 to vector<150x128xf32>
    %13 = arith.maximumf %11, %12 : vector<150x128xf32>
    %c0_11 = arith.constant 0 : index
    %c0_12 = arith.constant 0 : index
    %14 = vector.load %arg4[%c0_11, %c0_12] : memref<150x1xf32, #tpu.memory_space<vmem>>, vector<150x1xf32>
    %15 = vector.broadcast %14 : vector<150x1xf32> to vector<150x128xf32>
    %16 = arith.mulf %13, %15 : vector<150x128xf32>
    %cst_13 = arith.constant dense<0.000000e+00> : vector<128xf32>
    %17 = vector.multi_reduction <add>, %16, %cst_13 [0] : vector<150x128xf32> to vector<128xf32>
    %18 = vector.shape_cast %17 : vector<128xf32> to vector<1x128xf32>
    %c0_14 = arith.constant 0 : index
    %c0_15 = arith.constant 0 : index
    %19 = vector.load %arg5[%c0_14, %c0_15] : memref<1x1xf32, #tpu.memory_space<vmem>>, vector<1x1xf32>
    %20 = vector.broadcast %19 : vector<1x1xf32> to vector<1x128xf32>
    %21 = arith.addf %18, %20 : vector<1x128xf32>
    %cst_16 = arith.constant 0.000000e+00 : f32
    %22 = vector.broadcast %cst_16 : f32 to vector<1x128xf32>
    %23 = arith.maximumf %21, %22 : vector<1x128xf32>
    %c0_17 = arith.constant 0 : index
    %c0_18 = arith.constant 0 : index
    %24 = vector.load %arg6[%c0_17, %c0_18] : memref<1x128xf32, #tpu.memory_space<vmem>>, vector<1x128xf32>
    tpu.vector_store %arg6[%c0_17, %c0_18], %23 {strides = array<i32>} : memref<1x128xf32, #tpu.memory_space<vmem>>, vector<1x128xf32>,
    return
  }
  func.func @transform_0(%arg0: i32) -> (i32, i32) {
    %c0_i32 = arith.constant 0 : i32
    %c0_i32_0 = arith.constant 0 : i32
    return %c0_i32, %arg0 : i32, i32
  }
  func.func @transform_1(%arg0: i32) -> (i32, i32) {
    %c0_i32 = arith.constant 0 : i32
    %c0_i32_0 = arith.constant 0 : i32
    return %c0_i32, %arg0 : i32, i32
  }
  func.func @transform_2(%arg0: i32) -> (i32, i32) {
    %c0_i32 = arith.constant 0 : i32
    %c0_i32_0 = arith.constant 0 : i32
    %c0_i32_1 = arith.constant 0 : i32
    return %c0_i32, %c0_i32_0 : i32, i32
  }
  func.func @transform_3(%arg0: i32) -> (i32, i32) {
    %c0_i32 = arith.constant 0 : i32
    %c0_i32_0 = arith.constant 0 : i32
    %c0_i32_1 = arith.constant 0 : i32
    return %c0_i32, %c0_i32_0 : i32, i32
  }
  func.func @transform_4(%arg0: i32) -> (i32, i32) {
    %c0_i32 = arith.constant 0 : i32
    %c0_i32_0 = arith.constant 0 : i32
    %c0_i32_1 = arith.constant 0 : i32
    return %c0_i32, %c0_i32_0 : i32, i32
  }
  func.func @transform_5(%arg0: i32) -> (i32, i32) {
    %c0_i32 = arith.constant 0 : i32
    %c0_i32_0 = arith.constant 0 : i32
    return %c0_i32, %arg0 : i32, i32
  }
}

module attributes {stable_mosaic.version = 11 : i64} {
  func.func @site_kernel(%arg0: i32, %arg1: memref<8x1x128xf32, #tpu.memory_space<vmem>>, %arg2: memref<150x5xf32, #tpu.memory_space<vmem>>, %arg3: memref<150x1xf32, #tpu.memory_space<vmem>>, %arg4: memref<150x1xf32, #tpu.memory_space<vmem>>, %arg5: memref<1x1xf32, #tpu.memory_space<vmem>>, %arg6: memref<1x128xf32, #tpu.memory_space<vmem>>) attributes {dimension_semantics = [#tpu.dimension_semantics<parallel>], iteration_bounds = array<i64: 1>, scalar_prefetch = 0 : i64, scratch_operands = 0 : i64, tpu.core_type = #tpu.core_type<tc>, window_params = [{transform_indices = @transform_0, window_bounds = array<i64: 8, 1, 128>}, {pipeline_mode = #tpu.pipeline_mode<synchronous>, transform_indices = @transform_1, window_bounds = array<i64: 150, 5>}, {pipeline_mode = #tpu.pipeline_mode<synchronous>, transform_indices = @transform_2, window_bounds = array<i64: 150, 1>}, {pipeline_mode = #tpu.pipeline_mode<synchronous>, transform_indices = @transform_3, window_bounds = array<i64: 150, 1>}, {pipeline_mode = #tpu.pipeline_mode<synchronous>, transform_indices = @transform_4, window_bounds = array<i64: 1, 1>}, {transform_indices = @transform_5, window_bounds = array<i64: 1, 128>}]} {
    %c0 = arith.constant 0 : index
    %c0_0 = arith.constant 0 : index
    %c0_1 = arith.constant 0 : index
    %0 = vector.load %arg1[%c0, %c0_0, %c0_1] : memref<8x1x128xf32, #tpu.memory_space<vmem>>, vector<8x1x128xf32>
    %1 = vector.extract_strided_slice %0 {offsets = [0, 0, 0], sizes = [1, 1, 128], strides = [1, 1, 1]} : vector<8x1x128xf32> to vector<1x1x128xf32>
    %2 = vector.shape_cast %1 : vector<1x1x128xf32> to vector<1x128xf32>
    %3 = vector.extract_strided_slice %0 {offsets = [1, 0, 0], sizes = [1, 1, 128], strides = [1, 1, 1]} : vector<8x1x128xf32> to vector<1x1x128xf32>
    %4 = vector.shape_cast %3 : vector<1x1x128xf32> to vector<1x128xf32>
    %5 = vector.extract_strided_slice %0 {offsets = [2, 0, 0], sizes = [1, 1, 128], strides = [1, 1, 1]} : vector<8x1x128xf32> to vector<1x1x128xf32>
    %6 = vector.shape_cast %5 : vector<1x1x128xf32> to vector<1x128xf32>
    %7 = vector.extract_strided_slice %0 {offsets = [3, 0, 0], sizes = [1, 1, 128], strides = [1, 1, 1]} : vector<8x1x128xf32> to vector<1x1x128xf32>
    %8 = vector.shape_cast %7 : vector<1x1x128xf32> to vector<1x128xf32>
    %9 = vector.extract_strided_slice %0 {offsets = [4, 0, 0], sizes = [1, 1, 128], strides = [1, 1, 1]} : vector<8x1x128xf32> to vector<1x1x128xf32>
    %10 = vector.shape_cast %9 : vector<1x1x128xf32> to vector<1x128xf32>
    %11 = vector.extract_strided_slice %0 {offsets = [5, 0, 0], sizes = [1, 1, 128], strides = [1, 1, 1]} : vector<8x1x128xf32> to vector<1x1x128xf32>
    %12 = vector.shape_cast %11 : vector<1x1x128xf32> to vector<1x128xf32>
    %13 = vector.extract_strided_slice %0 {offsets = [6, 0, 0], sizes = [1, 1, 128], strides = [1, 1, 1]} : vector<8x1x128xf32> to vector<1x1x128xf32>
    %14 = vector.shape_cast %13 : vector<1x1x128xf32> to vector<1x128xf32>
    %15 = vector.extract_strided_slice %0 {offsets = [7, 0, 0], sizes = [1, 1, 128], strides = [1, 1, 1]} : vector<8x1x128xf32> to vector<1x1x128xf32>
    %16 = vector.shape_cast %15 : vector<1x1x128xf32> to vector<1x128xf32>
    %17 = arith.mulf %2, %2 : vector<1x128xf32>
    %18 = arith.addf %2, %4 : vector<1x128xf32>
    %19 = arith.mulf %4, %4 : vector<1x128xf32>
    %20 = arith.addf %17, %19 : vector<1x128xf32>
    %21 = arith.addf %18, %6 : vector<1x128xf32>
    %22 = arith.mulf %6, %6 : vector<1x128xf32>
    %23 = arith.addf %20, %22 : vector<1x128xf32>
    %24 = arith.addf %21, %8 : vector<1x128xf32>
    %25 = arith.mulf %8, %8 : vector<1x128xf32>
    %26 = arith.addf %23, %25 : vector<1x128xf32>
    %27 = arith.addf %24, %10 : vector<1x128xf32>
    %28 = arith.mulf %10, %10 : vector<1x128xf32>
    %29 = arith.addf %26, %28 : vector<1x128xf32>
    %30 = arith.addf %27, %12 : vector<1x128xf32>
    %31 = arith.mulf %12, %12 : vector<1x128xf32>
    %32 = arith.addf %29, %31 : vector<1x128xf32>
    %33 = arith.addf %30, %14 : vector<1x128xf32>
    %34 = arith.mulf %14, %14 : vector<1x128xf32>
    %35 = arith.addf %32, %34 : vector<1x128xf32>
    %36 = arith.addf %33, %16 : vector<1x128xf32>
    %37 = arith.mulf %16, %16 : vector<1x128xf32>
    %38 = arith.addf %35, %37 : vector<1x128xf32>
    %cst = arith.constant 1.250000e-01 : f32
    %39 = vector.broadcast %cst : f32 to vector<1x128xf32>
    %40 = arith.mulf %36, %39 : vector<1x128xf32>
    %41 = arith.mulf %36, %40 : vector<1x128xf32>
    %42 = arith.subf %38, %41 : vector<1x128xf32>
    %cst_2 = arith.constant 7.000000e+00 : f32
    %43 = vector.broadcast %cst_2 : f32 to vector<1x128xf32>
    %44 = arith.divf %42, %43 : vector<1x128xf32>
    %45 = arith.minimumf %2, %10 : vector<1x128xf32>
    %46 = arith.maximumf %2, %10 : vector<1x128xf32>
    %47 = arith.minimumf %4, %12 : vector<1x128xf32>
    %48 = arith.maximumf %4, %12 : vector<1x128xf32>
    %49 = arith.minimumf %6, %14 : vector<1x128xf32>
    %50 = arith.maximumf %6, %14 : vector<1x128xf32>
    %51 = arith.minimumf %8, %16 : vector<1x128xf32>
    %52 = arith.maximumf %8, %16 : vector<1x128xf32>
    %53 = arith.minimumf %45, %49 : vector<1x128xf32>
    %54 = arith.maximumf %45, %49 : vector<1x128xf32>
    %55 = arith.minimumf %47, %51 : vector<1x128xf32>
    %56 = arith.maximumf %47, %51 : vector<1x128xf32>
    %57 = arith.minimumf %46, %50 : vector<1x128xf32>
    %58 = arith.maximumf %46, %50 : vector<1x128xf32>
    %59 = arith.minimumf %48, %52 : vector<1x128xf32>
    %60 = arith.maximumf %48, %52 : vector<1x128xf32>
    %61 = arith.minimumf %54, %57 : vector<1x128xf32>
    %62 = arith.maximumf %54, %57 : vector<1x128xf32>
    %63 = arith.minimumf %56, %59 : vector<1x128xf32>
    %64 = arith.maximumf %56, %59 : vector<1x128xf32>
    %65 = arith.minimumf %53, %55 : vector<1x128xf32>
    %66 = arith.maximumf %53, %55 : vector<1x128xf32>
    %67 = arith.maximumf %61, %63 : vector<1x128xf32>
    %68 = arith.minimumf %62, %64 : vector<1x128xf32>
    %69 = arith.minimumf %58, %60 : vector<1x128xf32>
    %70 = arith.maximumf %58, %60 : vector<1x128xf32>
    %71 = arith.maximumf %66, %68 : vector<1x128xf32>
    %72 = arith.minimumf %67, %69 : vector<1x128xf32>
    %73 = arith.minimumf %72, %71 : vector<1x128xf32>
    %74 = tpu.concatenate %40, %44, %65, %73, %70 in 0 : vector<1x128xf32>, vector<1x128xf32>, vector<1x128xf32>, vector<1x128xf32>, vector<1x128xf32> -> vector<5x128xf32>
    %c0_3 = arith.constant 0 : index
    %c0_4 = arith.constant 0 : index
    %75 = vector.load %arg2[%c0_3, %c0_4] : memref<150x5xf32, #tpu.memory_space<vmem>>, vector<150x5xf32>
    %cst_5 = arith.constant dense<0.000000e+00> : vector<150x128xf32>
    %76 = tpu.matmul %75, %74, %cst_5 {dimension_numbers = #tpu.dot_dimension_numbers<[1], [0], [0], [1], [0, 0, 1, 1], [], []>} : vector<150x5xf32>, vector<5x128xf32>, vector<150x128xf32> -> vector<150x128xf32>
    %c0_6 = arith.constant 0 : index
    %c0_7 = arith.constant 0 : index
    %77 = vector.load %arg3[%c0_6, %c0_7] : memref<150x1xf32, #tpu.memory_space<vmem>>, vector<150x1xf32>
    %78 = vector.broadcast %77 : vector<150x1xf32> to vector<150x128xf32>
    %79 = arith.addf %76, %78 : vector<150x128xf32>
    %cst_8 = arith.constant 0.000000e+00 : f32
    %80 = vector.broadcast %cst_8 : f32 to vector<150x128xf32>
    %81 = arith.maximumf %79, %80 : vector<150x128xf32>
    %c0_9 = arith.constant 0 : index
    %c0_10 = arith.constant 0 : index
    %82 = vector.load %arg4[%c0_9, %c0_10] : memref<150x1xf32, #tpu.memory_space<vmem>>, vector<150x1xf32>
    %83 = vector.broadcast %82 : vector<150x1xf32> to vector<150x128xf32>
    %84 = arith.mulf %81, %83 : vector<150x128xf32>
    %cst_11 = arith.constant dense<0.000000e+00> : vector<128xf32>
    %85 = vector.multi_reduction <add>, %84, %cst_11 [0] : vector<150x128xf32> to vector<128xf32>
    %86 = vector.shape_cast %85 : vector<128xf32> to vector<1x128xf32>
    %c0_12 = arith.constant 0 : index
    %c0_13 = arith.constant 0 : index
    %87 = vector.load %arg5[%c0_12, %c0_13] : memref<1x1xf32, #tpu.memory_space<vmem>>, vector<1x1xf32>
    %88 = vector.broadcast %87 : vector<1x1xf32> to vector<1x128xf32>
    %89 = arith.addf %86, %88 : vector<1x128xf32>
    %90 = math.absf %89 : vector<1x128xf32>
    %cst_14 = arith.constant 0.000000e+00 : f32
    %91 = vector.broadcast %cst_14 : f32 to vector<1x128xf32>
    %92 = arith.subf %91, %90 : vector<1x128xf32>
    %93 = math.exp %92 : vector<1x128xf32>
    %cst_15 = arith.constant 0.000000e+00 : f32
    %94 = vector.broadcast %cst_15 : f32 to vector<1x128xf32>
    %95 = arith.cmpf oge, %89, %94 : vector<1x128xf32>
    %cst_16 = arith.constant 1.000000e+00 : f32
    %96 = vector.broadcast %cst_16 : f32 to vector<1x128xf32>
    %97 = arith.addf %96, %93 : vector<1x128xf32>
    %cst_17 = arith.constant 1.000000e+00 : f32
    %98 = vector.broadcast %cst_17 : f32 to vector<1x128xf32>
    %99 = arith.divf %98, %97 : vector<1x128xf32>
    %cst_18 = arith.constant 1.000000e+00 : f32
    %100 = vector.broadcast %cst_18 : f32 to vector<1x128xf32>
    %101 = arith.addf %100, %93 : vector<1x128xf32>
    %102 = arith.divf %93, %101 : vector<1x128xf32>
    %103 = arith.select %95, %99, %102 : vector<1x128xi1>, vector<1x128xf32>
    %c0_19 = arith.constant 0 : index
    %c0_20 = arith.constant 0 : index
    %104 = vector.load %arg6[%c0_19, %c0_20] : memref<1x128xf32, #tpu.memory_space<vmem>>, vector<1x128xf32>
    tpu.vector_store %arg6[%c0_19, %c0_20], %103 {strides = array<i32>} : memref<1x128xf32, #tpu.memory_space<vmem>>, vector<1x128xf32>,
    return
  }
  func.func @transform_0(%arg0: i32) -> (i32, i32, i32) {
    %c0_i32 = arith.constant 0 : i32
    %c0_i32_0 = arith.constant 0 : i32
    %c0_i32_1 = arith.constant 0 : i32
    return %c0_i32, %c0_i32_0, %arg0 : i32, i32, i32
  }
  func.func @transform_1(%arg0: i32) -> (i32, i32) {
    %c0_i32 = arith.constant 0 : i32
    %c0_i32_0 = arith.constant 0 : i32
    %c0_i32_1 = arith.constant 0 : i32
    return %c0_i32, %c0_i32_0 : i32, i32
  }
  func.func @transform_2(%arg0: i32) -> (i32, i32) {
    %c0_i32 = arith.constant 0 : i32
    %c0_i32_0 = arith.constant 0 : i32
    %c0_i32_1 = arith.constant 0 : i32
    return %c0_i32, %c0_i32_0 : i32, i32
  }
  func.func @transform_3(%arg0: i32) -> (i32, i32) {
    %c0_i32 = arith.constant 0 : i32
    %c0_i32_0 = arith.constant 0 : i32
    %c0_i32_1 = arith.constant 0 : i32
    return %c0_i32, %c0_i32_0 : i32, i32
  }
  func.func @transform_4(%arg0: i32) -> (i32, i32) {
    %c0_i32 = arith.constant 0 : i32
    %c0_i32_0 = arith.constant 0 : i32
    %c0_i32_1 = arith.constant 0 : i32
    return %c0_i32, %c0_i32_0 : i32, i32
  }
  func.func @transform_5(%arg0: i32) -> (i32, i32) {
    %c0_i32 = arith.constant 0 : i32
    %c0_i32_0 = arith.constant 0 : i32
    return %c0_i32, %arg0 : i32, i32
  }
}

</mosaic_0001>

<bundles_post_ra>
// kernel: multi_instance_forward.2
= control target key start
LH: loop header
LB: loop body
LE: loop exit
PB: predicated region body
PF: predicated region fallthrough
CT: control target
= control target key end

     0   :  { %s948_s20 = smov 0   ;;  %s1169_s0 = inlined_call_operand.vmem [shape: f32[8,256], index: 0, kind: input, shape index: {}]   ;;  %s1170_s1 = inlined_call_operand.vmem [shape: s32[1,256], index: 1, kind: input, shape index: {}]   ;;  %s1171_s2 = inlined_call_operand.vmem [shape: f32[150,26], index: 2, kind: input, shape index: {}]   ;;  %s1172_s3 = inlined_call_operand.vmem [shape: f32[150,1], index: 3, kind: input, shape index: {}]   ;;  %s1173_s4 = inlined_call_operand.<no memory space> [shape: f32[1,1], index: 4, kind: input, shape index: {}]   ;;  %s1174_s5 = inlined_call_operand.vmem [shape: f32[1,256], index: 5, kind: output, shape index: {}]  }
   0x1   :  { %v10_v0 = vstv %s1173_s4 }
   0x2   :  { %11 = vst [vmem:[#allocation3] sm:$0x1] %v10_v0 }
   0x3 LB: > { %s749_s21 = sadd.s32 4294967295, %s907_s20   ;;  %p753_p0 = scmp.ge.s32.totalorder %s907_s20, 1  ;;  %s907_s20 = sphi %s948_s20, %s17_s20  }
   0x4   : > { %p196_p1 = scmp.lt.s32.totalorder %s907_s20, 3 }
   0x6   : > { %p197_p2 = pnand %p753_p0, %p196_p1 }
   0x7   : > { %p224_p3 = scmp.lt.s32.totalorder (!%p197_p2), %s749_s21, 1  ;;  %v237_v1 = vlaneseq (!%p197_p2)  ;;  %v909_v2 = vmov (!%p197_p2), 0.0|0.0   ;;  %vm910_vm0 = vmmov (!%p197_p2), 0   ;;  %v911_v4 = vmov (!%p197_p2), 0.0   ;;  %v521_v12 = vld [vmem:[%s1172_s3] sm:$0xff] (!%p197_p2)  ;;  %v523_v13 = vld [vmem:[%s1172_s3 + $0x10] sm:$0xff] (!%p197_p2) }
   0x8   : > { %200 = sbr.rel (%p197_p2) target bundleno = 322 (0x142), region = 40  ;;  %869 = vmatprep.subr.bf16.mxu0 (!%p197_p2), %v909_v2  ;;  %876 = vmatprep.subr.bf16.mxu1 (!%p197_p2), %v909_v2  ;;  %v912_v5 = vmov (!%p197_p2), 0   ;;  %vm913_vm4 = vmmov (!%p197_p2), 1   ;;  %v914_v14 = vmov (!%p197_p2), 1.0   ;;  %v522_v16 = vld [vmem:[%s1172_s3 + $0x8] sm:$0xff] (!%p197_p2)  ;;  %v524_v17 = vld [vmem:[%s1172_s3 + $0x18] sm:$0xff] (!%p197_p2) }
   0x9   : > { %v958_v3 = vshrl.u32 (!%p197_p2), %v237_v1, 7  ;;  %812 = vmatprep.mubr.msk.f32.mxu0 (!%p197_p2), %vm910_vm0, %v911_v4  ;;  %842 = vmatprep.mubr.msk.f32.mxu1 (!%p197_p2), %vm910_vm0, %v911_v4  ;;  %vm338_vm6 = vcmask (!%p197_p2), 1041408   ;;  %v525_v18 = vld [vmem:[%s1172_s3 + $0x20] sm:$0xff] (!%p197_p2)  ;;  %v526_v19 = vld [vmem:[%s1172_s3 + $0x28] sm:$0xff] (!%p197_p2)  ;;  %vm280_vm8 = vcmask (!%p197_p2), 211968   ;;  %v267_v23 = vld [vmem:[%s1171_s2 + $0x50] sm:$0xff] (!%p197_p2) }
   0xa   : > { %893 = vset.pattern.permute.xlu0 (!%p197_p2), %v912_v5  ;;  %894 = vset.pattern.permute.xlu1 (!%p197_p2), %v912_v5  ;;  %vm874_vm7 = vmpackc.low (!%p197_p2), %vm338_vm6, %vm913_vm4  ;;  %v257_v22 = vld [vmem:[%s1171_s2] sm:$0xff] (!%p197_p2)  ;;  %v527_v24 = vld [vmem:[%s1172_s3 + $0x30] sm:$0xff] (!%p197_p2)  ;;  %vm671_vm9 = vcmask (!%p197_p2), 1045504  }
   0xb   : > { %v239_v6 = vadd.s32 (!%p197_p2), 8, %v958_v3  ;;  %v240_v7 = vadd.s32 (!%p197_p2), 16, %v958_v3  ;;  %542 = vperm.xlu0 (!%p197_p2), %893, %v521_v12   ;;  %552 = vperm.xlu1 (!%p197_p2), %894, %v523_v13   ;;  %v528_v25 = vld [vmem:[%s1172_s3 + $0x38] sm:$0xff] (!%p197_p2)  ;;  %v258_v26 = vld [vmem:[%s1171_s2 + $0x8] sm:$0xff] (!%p197_p2)  ;;  %v529_v28 = vld [vmem:[%s1172_s3 + $0x40] sm:$0xff] (!%p197_p2) }
   0xc   : > { %v268_v27 = vld [vmem:[%s1171_s2 + $0x58] sm:$0xff] (!%p197_p2)  ;;  %v530_v29 = vld [vmem:[%s1172_s3 + $0x48] sm:$0xff] (!%p197_p2)  ;;  %v259_v30 = vld [vmem:[%s1171_s2 + $0x10] sm:$0xff] (!%p197_p2) }
   0xd   : > { %v269_v31 = vld [vmem:[%s1171_s2 + $0x60] sm:$0xff] (!%p197_p2)  ;;  %v531_v32 = vld [vmem:[%s1172_s3 + $0x50] sm:$0xff] (!%p197_p2)  ;;  %v532_v33 = vld [vmem:[%s1172_s3 + $0x58] sm:$0xff] (!%p197_p2) }
   0xe   : > { %v260_v34 = vld [vmem:[%s1171_s2 + $0x18] sm:$0xff] (!%p197_p2)  ;;  %v270_v35 = vld [vmem:[%s1171_s2 + $0x68] sm:$0xff] (!%p197_p2)  ;;  %v533_v36 = vld [vmem:[%s1172_s3 + $0x60] sm:$0xff] (!%p197_p2) }
   0xf   : > { %s1176_s21 = smov (!%p224_p3, %s749_s21), 1  ;;  %547 = vperm.xlu0 %893, %v522_v16   ;;  %557 = vperm.xlu1 %894, %v524_v17   ;;  %v534_v37 = vld [vmem:[%s1172_s3 + $0x68] sm:$0xff]  ;;  %v261_v38 = vld [vmem:[%s1171_s2 + $0x20] sm:$0xff]  ;;  %v271_v39 = vld [vmem:[%s1171_s2 + $0x70] sm:$0xff] }
  0x10   : > { %s754_s4 = sshll.u32 %s1176_s21, 3  ;;  %s230_s24 = scalar_lea.vmem %s1170_s1, %s1176_s21  ;;  %v535_v40 = vld [vmem:[%s1172_s3 + $0x70] sm:$0xff]  ;;  %v536_v41 = vld [vmem:[%s1172_s3 + $0x78] sm:$0xff]  ;;  %v262_v42 = vld [vmem:[%s1171_s2 + $0x28] sm:$0xff] }
  0x11   : > { %s227_s27 = scalar_lea.vmem %s1169_s0, %s754_s4  ;;  %v755_v8 = vld [vmem:[%s230_s24] ss:$0 sm:$0xff]  ;;  %v272_v43 = vld [vmem:[%s1171_s2 + $0x78] sm:$0xff]  ;;  %v538_v45 = vld [vmem:[%s1172_s3 + $0x88] sm:$0xff]  ;;  %s233_s9 = scalar_lea.vmem %s1174_s5, %s1176_s21 }
  0x12   : > { %v234_v9 = vld [vmem:[%s227_s27] sm:$0xff]  ;;  %vm245_vm1 = vcmp.eq.s32.totalorder %v958_v3, %v755_v8  ;;  %vm246_vm2 = vcmp.eq.s32.totalorder %v239_v6, %v755_v8  ;;  %vm247_vm3 = vcmp.eq.s32.totalorder %v240_v7, %v755_v8  ;;  %v263_v46 = vld [vmem:[%s1171_s2 + $0x30] sm:$0xff]  ;;  %v264_v50 = vld [vmem:[%s1171_s2 + $0x38] sm:$0xff] }
  0x13   : > { %v757_v10 = vsel %vm246_vm2, 1.0, %v911_v4  ;;  %v758_v11 = vsel %vm247_vm3, 1.0, %v911_v4  ;;  %vm895_vm5 = vmpackc.low %vm245_vm1, %vm913_vm4  ;;  %v896_v15 = vpack.c.bf16 %v914_v14, %v234_v9  ;;  %562 = vperm.xlu0 %893, %v525_v18   ;;  %567 = vperm.xlu1 %894, %v526_v19   ;;  %v537_v44 = vld [vmem:[%s1172_s3 + $0x80] sm:$0xff]  ;;  %v539_v48 = vld [vmem:[%s1172_s3 + $0x90] sm:$0x3f] }
  0x14   : > { %256 = vst [vmem:[#allocation2 + $0x18] sm:$0x3] %v758_v11  ;;  %v273_v47 = vld [vmem:[%s1171_s2 + $0x80] sm:$0xff]  ;;  %v274_v51 = vld [vmem:[%s1171_s2 + $0x88] sm:$0xff]  ;;  %v275_v53 = vld [vmem:[%s1171_s2 + $0x90] sm:$0x3f] }
  0x15   : > { %897 = vmatpush3.bf16.msk.msra.mxu0 %vm895_vm5, %v896_v15  ;;  %900 = vmatpush3.bf16.msk.msra.mxu1 %vm895_vm5, %v896_v15  ;;  %v680_v49 = vld [vmem:[#allocation3] sm:$0x1]  ;;  %v266_v54 = vld [vmem:[%s1171_s2 + $0x48] sm:$0xff] }
  0x16   : > { %872 = vmatprep.subr.bf16.mxu0 %v909_v2  ;;  %877 = vmatprep.subr.bf16.mxu1 %v909_v2  ;;  %v265_v52 = vld [vmem:[%s1171_s2 + $0x40] sm:$0xff] }
  0x17   : > { %572 = vperm.xlu0 %893, %v527_v24   ;;  %577 = vperm.xlu1 %894, %v528_v25  }
  0x1b   : > { %v279_v20 = vld [vmem:[#allocation2 + $0x18] sm:$0x3]  ;;  %582 = vperm.xlu0 %893, %v529_v28   ;;  %587 = vperm.xlu1 %894, %v530_v29  }
  0x1c   : > { %v873_v21 = vpack.c.bf16 %v279_v20, %v757_v10 }
  0x1e   : > { %875 = vmatpush3.bf16.msk.msra.mxu0 %vm874_vm7, %v873_v21  ;;  %879 = vmatpush3.bf16.msk.msra.mxu1 %vm874_vm7, %v873_v21 }
  0x1f   : > { %592 = vperm.xlu0 %893, %v531_v32   ;;  %597 = vperm.xlu1 %894, %v532_v33  }
  0x21   : > { %813 = vmatmul.mubr.msk.f32.vlgmr.msra.gmra.mrb[0].mxu0 %vm280_vm8, %v257_v22  ;;  %843 = vmatmul.mubr.msk.f32.vlgmr.msra.gmra.mrb[0].mxu1 %vm280_vm8, %v267_v23 }
  0x22   : > { %815 = vmatprep.mubr.msk.f32.mxu0 %vm910_vm0, %v911_v4  ;;  %845 = vmatprep.mubr.msk.f32.mxu1 %vm910_vm0, %v911_v4 }
  0x23   : > { %602 = vperm.xlu0 %893, %v533_v36   ;;  %607 = vperm.xlu1 %894, %v534_v37  }
  0x25   : > { %816 = vmatmul.mubr.msk.f32.gmra.mrb[2].mxu0 %vm280_vm8, %v258_v26  ;;  %846 = vmatmul.mubr.msk.f32.gmra.mrb[2].mxu1 %vm280_vm8, %v268_v27 }
  0x26   : > { %818 = vmatprep.mubr.msk.f32.mxu0 %vm910_vm0, %v911_v4  ;;  %848 = vmatprep.mubr.msk.f32.mxu1 %vm910_vm0, %v911_v4 }
  0x27   : > { %612 = vperm.xlu0 %893, %v535_v40   ;;  %617 = vperm.xlu1 %894, %v536_v41  }
  0x29   : > { %819 = vmatmul.mubr.msk.f32.gmra.mrb[4].mxu0 %vm280_vm8, %v259_v30  ;;  %849 = vmatmul.mubr.msk.f32.gmra.mrb[4].mxu1 %vm280_vm8, %v269_v31 }
  0x2a   : > { %821 = vmatprep.mubr.msk.f32.mxu0 %vm910_vm0, %v911_v4  ;;  %851 = vmatprep.mubr.msk.f32.mxu1 %vm910_vm0, %v911_v4 }
  0x2b   : > { %622 = vperm.xlu0 %893, %v537_v44   ;;  %627 = vperm.xlu1 %894, %v538_v45  }
  0x2d   : > { %822 = vmatmul.mubr.msk.f32.gmra.mrb[6].mxu0 %vm280_vm8, %v260_v34  ;;  %852 = vmatmul.mubr.msk.f32.gmra.mrb[6].mxu1 %vm280_vm8, %v270_v35 }
  0x2e   : > { %824 = vmatprep.mubr.msk.f32.mxu0 %vm910_vm0, %v911_v4  ;;  %854 = vmatprep.mubr.msk.f32.mxu1 %vm910_vm0, %v911_v4 }
  0x2f   : > { %632 = vperm.xlu0 %893, %v539_v48   ;;  %683 = vperm.xlu1 %894, %v680_v49  }
  0x31   : > { %825 = vmatmul.mubr.msk.f32.gmra.mrb[8].mxu0 %vm280_vm8, %v261_v38  ;;  %855 = vmatmul.mubr.msk.f32.gmra.mrb[8].mxu1 %vm280_vm8, %v271_v39 }
  0x32   : > { %827 = vmatprep.mubr.msk.f32.mxu0 %vm910_vm0, %v911_v4  ;;  %857 = vmatprep.mubr.msk.f32.mxu1 %vm910_vm0, %v911_v4 }
  0x35   : > { %828 = vmatmul.mubr.msk.f32.gmra.mrb[10].mxu0 %vm280_vm8, %v262_v42  ;;  %858 = vmatmul.mubr.msk.f32.gmra.mrb[10].mxu1 %vm280_vm8, %v272_v43 }
  0x36   : > { %830 = vmatprep.mubr.msk.f32.mxu0 %vm910_vm0, %v911_v4  ;;  %860 = vmatprep.mubr.msk.f32.mxu1 %vm910_vm0, %v911_v4 }
  0x39   : > { %831 = vmatmul.mubr.msk.f32.gmra.mrb[12].mxu0 %vm280_vm8, %v263_v46  ;;  %861 = vmatmul.mubr.msk.f32.gmra.mrb[12].mxu1 %vm280_vm8, %v273_v47 }
  0x3a   : > { %833 = vmatprep.mubr.msk.f32.mxu0 %vm910_vm0, %v911_v4  ;;  %863 = vmatprep.mubr.msk.f32.mxu1 %vm910_vm0, %v911_v4 }
  0x3d   : > { %834 = vmatmul.mubr.msk.f32.gmra.mrb[14].mxu0 %vm280_vm8, %v264_v50  ;;  %864 = vmatmul.mubr.msk.f32.gmra.mrb[14].mxu1 %vm280_vm8, %v274_v51 }
  0x3e   : > { %836 = vmatprep.mubr.msk.f32.mxu0 %vm910_vm0, %v911_v4  ;;  %866 = vmatprep.mubr.msk.f32.mxu1 %vm910_vm0, %v911_v4 }
  0x41   : > { %837 = vmatmul.mubr.msk.f32.gmra.mrb[16].mxu0 %vm280_vm8, %v265_v52  ;;  %867 = vmatmul.mubr.msk.f32.gmra.mrb[16].mxu1 %vm280_vm8, %v275_v53 }
  0x42   : > { %839 = vmatprep.mubr.msk.f32.mxu0 %vm910_vm0, %v911_v4 }
  0x45   : > { %840 = vmatmul.mubr.msk.f32.gmra.mrb[18].mxu0 %vm280_vm8, %v266_v54 }
  0x8a   : > { %v543_v55 = vpop.permute.xlu0 %542  ;;  %v553_v57 = vpop.permute.xlu1 %552 }
  0x8e   : > { %v548_v56 = vpop.permute.xlu0 %547  ;;  %v558_v6 = vpop.permute.xlu1 %557 }
  0x92   : > { %v563_v62 = vpop.permute.xlu0 %562  ;;  %v568_v23 = vpop.permute.xlu1 %567 }
  0x96   : > { %v573_v15 = vpop.permute.xlu0 %572  ;;  %v578_v39 = vpop.permute.xlu1 %577 }
  0x9a   : > { %v583_v31 = vpop.permute.xlu0 %582 }
  0x9e   : > { %v593_v47 = vpop.permute.xlu0 %592 }
  0xf4   : > { %v408_v58 = vpop.f32.mrb[0].mxu0  ;;  %v1146_v59 = vpop.f32.mrb[0].mxu1 }
  0xf5   : > { %v814_v60 = vpop.f32.mrb[1].mxu0  ;;  %v844_v61 = vpop.f32.mrb[1].mxu1  ;;  %v502_v63 = vmax.f32 %v408_v58, 0.0 }
  0xf7   : > { %v635_v7 = vmul.f32 %v543_v55, %v502_v63  ;;  %v588_v55 = vpop.permute.xlu1 %587 }
  0xf8   : > { %v413_v0 = vpop.f32.mrb[2].mxu0  ;;  %v1148_v1 = vpop.f32.mrb[2].mxu1 }
  0xf9   : > { %v503_v2 = vmax.f32 %v413_v0, 0.0  ;;  %v817_v4 = vpop.f32.mrb[3].mxu0  ;;  %v847_v5 = vpop.f32.mrb[3].mxu1 }
  0xfa   : > { %v603_v0 = vpop.permute.xlu0 %602 }
  0xfb   : > { %v636_v8 = vmul.f32 %v548_v56, %v503_v2  ;;  %v598_v4 = vpop.permute.xlu1 %597 }
  0xfc   : > { %v418_v9 = vpop.f32.mrb[4].mxu0  ;;  %v1150_v10 = vpop.f32.mrb[4].mxu1 }
  0xfd   : > { %v654_v11 = vadd.f32 %v636_v8, %v635_v7  ;;  %v504_v12 = vmax.f32 %v418_v9, 0.0  ;;  %v820_v13 = vpop.f32.mrb[5].mxu0  ;;  %v850_v14 = vpop.f32.mrb[5].mxu1 }
  0xfe   : > { %v613_v14 = vpop.permute.xlu0 %612 }
  0xff   : > { %v637_v16 = vmul.f32 %v553_v57, %v504_v12 }
 0x100   : > { %v423_v17 = vpop.f32.mrb[6].mxu0  ;;  %v1152_v18 = vpop.f32.mrb[6].mxu1 }
 0x101   : > { %v655_v19 = vadd.f32 %v654_v11, %v637_v16  ;;  %v505_v20 = vmax.f32 %v423_v17, 0.0  ;;  %v823_v21 = vpop.f32.mrb[7].mxu0  ;;  %v853_v22 = vpop.f32.mrb[7].mxu1  ;;  %v513_v11 = vmax.f32 %v1148_v1, 0.0 }
 0x102   : > { %v608_v17 = vpop.permute.xlu1 %607 }
 0x103   : > { %v638_v24 = vmul.f32 %v558_v6, %v505_v20  ;;  %v512_v6 = vmax.f32 %v1146_v59, 0.0  ;;  %v515_v20 = vmax.f32 %v1152_v18, 0.0 }
 0x104   : > { %v428_v25 = vpop.f32.mrb[8].mxu0  ;;  %v1154_v26 = vpop.f32.mrb[8].mxu1 }
 0x105   : > { %v656_v27 = vadd.f32 %v655_v19, %v638_v24  ;;  %v506_v28 = vmax.f32 %v428_v25, 0.0  ;;  %v826_v29 = vpop.f32.mrb[9].mxu0  ;;  %v856_v30 = vpop.f32.mrb[9].mxu1  ;;  %v645_v13 = vmul.f32 %v593_v47, %v512_v6  ;;  %v646_v19 = vmul.f32 %v598_v4, %v513_v11 }
 0x106   : > { %v623_v24 = vpop.permute.xlu0 %622  ;;  %v648_v25 = vmul.f32 %v608_v17, %v515_v20  ;;  %v618_v1 = vpop.permute.xlu1 %617 }
 0x107   : > { %v639_v32 = vmul.f32 %v563_v62, %v506_v28 }
 0x108   : > { %v433_v33 = vpop.f32.mrb[10].mxu0  ;;  %v483_v34 = vpop.f32.mrb[10].mxu1 }
 0x109   : > { %v657_v35 = vadd.f32 %v656_v27, %v639_v32  ;;  %v507_v36 = vmax.f32 %v433_v33, 0.0  ;;  %v829_v37 = vpop.f32.mrb[11].mxu0  ;;  %v859_v38 = vpop.f32.mrb[11].mxu1  ;;  %v517_v27 = vmax.f32 %v483_v34, 0.0 }
 0x10a   : > { %v628_v38 = vpop.permute.xlu1 %627 }
 0x10b   : > { %v640_v40 = vmul.f32 %v568_v23, %v507_v36  ;;  %v516_v23 = vmax.f32 %v1154_v26, 0.0  ;;  %v633_v36 = vpop.permute.xlu0 %632 }
 0x10c   : > { %v438_v41 = vpop.f32.mrb[12].mxu0  ;;  %v488_v42 = vpop.f32.mrb[12].mxu1 }
 0x10d   : > { %v658_v43 = vadd.f32 %v657_v35, %v640_v40  ;;  %v508_v44 = vmax.f32 %v438_v41, 0.0  ;;  %v832_v45 = vpop.f32.mrb[13].mxu0  ;;  %v862_v46 = vpop.f32.mrb[13].mxu1  ;;  %v649_v29 = vmul.f32 %v613_v14, %v516_v23  ;;  %v518_v30 = vmax.f32 %v488_v42, 0.0 }
 0x10e   : > { %v688_v46 = vsub.s32 0, %v958_v3 }
 0x10f   : > { %v641_v48 = vmul.f32 %v573_v15, %v508_v44  ;;  %v514_v15 = vmax.f32 %v1150_v10, 0.0  ;;  %v650_v10 = vmul.f32 %v618_v1, %v517_v27  ;;  %v651_v37 = vmul.f32 %v623_v24, %v518_v30 }
 0x110   : > { %v443_v49 = vpop.f32.mrb[14].mxu0  ;;  %v493_v50 = vpop.f32.mrb[14].mxu1 }
 0x111   : > { %v659_v51 = vadd.f32 %v658_v43, %v641_v48  ;;  %v509_v52 = vmax.f32 %v443_v49, 0.0  ;;  %v835_v53 = vpop.f32.mrb[15].mxu0  ;;  %v865_v54 = vpop.f32.mrb[15].mxu1  ;;  %v647_v22 = vmul.f32 %v603_v0, %v514_v15  ;;  %v519_v33 = vmax.f32 %v493_v50, 0.0 }
 0x112   : > { %v684_v48 = vpop.permute.xlu1 %683 }
 0x113   : > { %v642_v56 = vmul.f32 %v578_v39, %v509_v52  ;;  %v652_v40 = vmul.f32 %v628_v38, %v519_v33  ;;  %v689_v50 = vrot.slane %v684_v48, %v688_v46 }
 0x114   : > { %v448_v57 = vpop.f32.mrb[16].mxu0  ;;  %v498_v58 = vpop.f32.mrb[16].mxu1 }
 0x115   : > { %v660_v60 = vadd.f32 %v659_v51, %v642_v56  ;;  %v510_v61 = vmax.f32 %v448_v57, 0.0  ;;  %v838_v62 = vpop.f32.mrb[17].mxu0  ;;  %v868_v63 = vpop.f32.mrb[17].mxu1  ;;  %v520_v32 = vmax.f32 %v498_v58, 0.0 }
 0x117   : > { %v643_v2 = vmul.f32 %v583_v31, %v510_v61  ;;  %v653_v39 = vmul.f32 %v633_v36, %v520_v32 }
 0x118   : > { %v453_v5 = vpop.f32.mrb[18].mxu0 }
 0x119   : > { %v661_v7 = vadd.f32 %v660_v60, %v643_v2  ;;  %v511_v8 = vmax.f32 %v453_v5, 0.0  ;;  %v841_v9 = vpop.f32.mrb[19].mxu0  ;;  %v672_v34 = vsel %vm671_vm9, %v653_v39, 0.0 }
 0x11b   : > { %v644_v12 = vmul.f32 %v588_v55, %v511_v8 }
 0x11d   : > { %v662_v16 = vadd.f32 %v661_v7, %v644_v12 }
 0x11f   : > { %v663_v21 = vadd.f32 %v662_v16, %v645_v13 }
 0x121   : > { %v664_v59 = vadd.f32 %v663_v21, %v646_v19 }
 0x123   : > { %v665_v28 = vadd.f32 %v664_v59, %v647_v22 }
 0x125   : > { %v666_v31 = vadd.f32 %v665_v28, %v648_v25 }
 0x127   : > { %v667_v35 = vadd.f32 %v666_v31, %v649_v29 }
 0x129   : > { %v668_v18 = vadd.f32 %v667_v35, %v650_v10 }
 0x12b   : > { %v669_v26 = vadd.f32 %v668_v18, %v651_v37 }
 0x12d   : > { %v670_v41 = vadd.f32 %v669_v26, %v652_v40 }
 0x12f   : > { %v673_v43 = vadd.f32 %v672_v34, %v670_v41 }
 0x131   : > { %v674_v44 = vrot.slane %v673_v43, 4 }
 0x133   : > { %v675_v45 = vadd.f32 %v674_v44, %v673_v43 }
 0x135   : > { %v676_v42 = vrot.slane %v675_v45, 2 }
 0x137   : > { %v677_v47 = vadd.f32 %v676_v42, %v675_v45 }
 0x139   : > { %v678_v49 = vrot.slane %v677_v47, 1 }
 0x13b   : > { %v679_v51 = vadd.f32 %v678_v49, %v677_v47 }
 0x13d   : > { %v690_v52 = vadd.f32 %v689_v50, %v679_v51 }
 0x13f   : > { %v691_v53 = vmax.f32 %v690_v52, 0.0 }
 0x141   : > { %692 = vst [vmem:[%s233_s9] sm:$0x1] %v691_v53 }
 0x142 PF: > { %s17_s20 = sadd.s32 1, %s907_s20  }
 0x143   : > { %p14_p4 = scmp.ge.s32.totalorder %s17_s20, 4  }
 0x145   :  { %16 = sbr.rel (!%p14_p4) target bundleno = 3 (0x3), region = 73 }

// kernel: multi_instance_forward.3
= control target key start
LH: loop header
LB: loop body
LE: loop exit
PB: predicated region body
PF: predicated region fallthrough
CT: control target
= control target key end

     0   :  { %v787_v0 = vmov 0   ;;  %v788_v8 = vmov 0.0   ;;  %v87_v15 = vlaneseq  ;;  %vm789_vm0 = vmmov 0   ;;  %s1141_s2 = inlined_call_operand.vmem [shape: f32[150,1], index: 2, kind: input, shape index: {}]   ;;  %s1142_s0 = inlined_call_operand.vmem [shape: f32[8,1,128], index: 0, kind: input, shape index: {}]   ;;  %s1143_s4 = inlined_call_operand.<no memory space> [shape: f32[1,1], index: 4, kind: input, shape index: {}]   ;;  %s1144_s3 = inlined_call_operand.vmem [shape: f32[150,1], index: 3, kind: input, shape index: {}]   ;;  %s1145_s1 = inlined_call_operand.vmem [shape: f32[150,5], index: 1, kind: input, shape index: {}]   ;;  %s1146_s5 = inlined_call_operand.vmem [shape: f32[1,128], index: 5, kind: output, shape index: {}]  }
   0x1   :  { %781 = vset.pattern.permute.xlu0 %v787_v0  ;;  %v137_v1 = vld [vmem:[%s1141_s2] sm:$0xff]  ;;  %782 = vset.pattern.permute.xlu1 %v787_v0  ;;  %v139_v2 = vld [vmem:[%s1141_s2 + $0x10] sm:$0xff]  ;;  %v10_v3 = vstv %s1143_s4  ;;  %v138_v7 = vld [vmem:[%s1141_s2 + $0x8] sm:$0xff]  ;;  %vm110_vm1 = vcmask 1040384   ;;  %vm112_vm2 = vcmask 1041408   ;;  %vm114_vm3 = vcmask 1042432  }
   0x2   :  { %158 = vperm.xlu0 %781, %v137_v1   ;;  %168 = vperm.xlu1 %782, %v139_v2   ;;  %v22_v4 = vld [vmem:[%s1142_s0] sm:$0x1]  ;;  %v23_v5 = vld [vmem:[%s1142_s0 + $0x1] sm:$0x1]  ;;  %v24_v6 = vld [vmem:[%s1142_s0 + $0x2] sm:$0x1] }
   0x3   :  { %11 = vst [vmem:[#allocation2] sm:$0x1] %v10_v3  ;;  %717 = vmatprep.subr.mxu0 %v788_v8  ;;  %776 = vmatprep.subr.mxu1 %v788_v8  ;;  %v30_v9 = vmul.f32 %v22_v4, %v22_v4  ;;  %v31_v10 = vadd.f32 %v23_v5, %v22_v4  ;;  %v25_v12 = vld [vmem:[%s1142_s0 + $0x3] sm:$0x1]  ;;  %v26_v13 = vld [vmem:[%s1142_s0 + $0x4] sm:$0x1] }
   0x4   :  { %v32_v11 = vmul.f32 %v23_v5, %v23_v5  ;;  %v35_v14 = vmul.f32 %v24_v6, %v24_v6  ;;  %v27_v16 = vld [vmem:[%s1142_s0 + $0x5] sm:$0x1]  ;;  %v29_v17 = vld [vmem:[%s1142_s0 + $0x7] sm:$0x1]  ;;  %v38_v20 = vmul.f32 %v25_v12, %v25_v12  ;;  %v41_v21 = vmul.f32 %v26_v13, %v26_v13  ;;  %v140_v22 = vld [vmem:[%s1141_s2 + $0x18] sm:$0xff]  ;;  %719 = vmatprep.mubr.msk.f32.mxu0 %vm789_vm0, %v788_v8 }
   0x5   :  { %v34_v19 = vadd.f32 %v31_v10, %v24_v6  ;;  %v28_v23 = vld [vmem:[%s1142_s0 + $0x6] sm:$0x1]  ;;  %v57_v24 = vmin.f32 %v22_v4, %v26_v13  ;;  %v58_v25 = vmax.f32 %v22_v4, %v26_v13  ;;  %v59_v26 = vmin.f32 %v23_v5, %v27_v16  ;;  %v493_v37 = vld [vmem:[%s1144_s3 + $0x8] sm:$0xff]  ;;  %v494_v59 = vld [vmem:[%s1144_s3 + $0x10] sm:$0xff]  ;;  %749 = vmatprep.mubr.msk.f32.mxu1 %vm789_vm0, %v788_v8 }
   0x6   :  { %v33_v18 = vadd.f32 %v32_v11, %v30_v9  ;;  %163 = vperm.xlu0 %781, %v138_v7   ;;  %v60_v27 = vmax.f32 %v23_v5, %v27_v16  ;;  %v61_v30 = vmin.f32 %v24_v6, %v28_v23  ;;  %v62_v31 = vmax.f32 %v24_v6, %v28_v23  ;;  %v492_v32 = vld [vmem:[%s1144_s3] sm:$0xff]  ;;  %v142_v1 = vld [vmem:[%s1141_s2 + $0x28] sm:$0xff]  ;;  %v495_v7 = vld [vmem:[%s1144_s3 + $0x18] sm:$0xff] }
   0x7   :  { %v37_v29 = vadd.f32 %v34_v19, %v25_v12  ;;  %173 = vperm.xlu1 %782, %v140_v22   ;;  %v44_v33 = vmul.f32 %v27_v16, %v27_v16  ;;  %v47_v34 = vmul.f32 %v28_v23, %v28_v23  ;;  %v63_v35 = vmin.f32 %v25_v12, %v29_v17  ;;  %v141_v50 = vld [vmem:[%s1141_s2 + $0x20] sm:$0xff]  ;;  %v143_v10 = vld [vmem:[%s1141_s2 + $0x30] sm:$0xff]  ;;  %v497_v22 = vld [vmem:[%s1144_s3 + $0x28] sm:$0xff] }
   0x8   :  { %v36_v28 = vadd.f32 %v35_v14, %v33_v18  ;;  %v64_v36 = vmax.f32 %v25_v12, %v29_v17  ;;  %v65_v40 = vmin.f32 %v57_v24, %v61_v30  ;;  %v66_v41 = vmax.f32 %v57_v24, %v61_v30  ;;  %v144_v18 = vld [vmem:[%s1141_s2 + $0x38] sm:$0xff] }
   0x9   :  { %v40_v39 = vadd.f32 %v37_v29, %v26_v13  ;;  %v67_v42 = vmin.f32 %v59_v26, %v63_v35  ;;  %v68_v43 = vmax.f32 %v59_v26, %v63_v35  ;;  %v69_v44 = vmin.f32 %v58_v25, %v62_v31  ;;  %v128_v29 = vld [vmem:[%s1145_s1 + $0x50] sm:$0xff] }
   0xa   :  { %v39_v38 = vadd.f32 %v38_v20, %v36_v28  ;;  %v70_v45 = vmax.f32 %v58_v25, %v62_v31  ;;  %513 = vperm.xlu0 %781, %v492_v32   ;;  %v71_v48 = vmin.f32 %v60_v27, %v64_v36  ;;  %v72_v49 = vmax.f32 %v60_v27, %v64_v36  ;;  %v145_v25 = vld [vmem:[%s1141_s2 + $0x40] sm:$0xff]  ;;  %v146_v31 = vld [vmem:[%s1141_s2 + $0x48] sm:$0xff]  ;;  %v498_v32 = vld [vmem:[%s1144_s3 + $0x30] sm:$0xff] }
   0xb   :  { %v43_v47 = vadd.f32 %v40_v39, %v27_v16  ;;  %518 = vperm.xlu1 %782, %v493_v37   ;;  %v50_v51 = vmul.f32 %v29_v17, %v29_v17  ;;  %v73_v52 = vmin.f32 %v66_v41, %v69_v44  ;;  %v74_v53 = vmax.f32 %v66_v41, %v69_v44  ;;  %v118_v28 = vld [vmem:[%s1145_s1] sm:$0xff]  ;;  %v147_v35 = vld [vmem:[%s1141_s2 + $0x50] sm:$0xff]  ;;  %v499_v36 = vld [vmem:[%s1144_s3 + $0x38] sm:$0xff] }
   0xc   :  { %v42_v46 = vadd.f32 %v41_v21, %v39_v38  ;;  %v78_v54 = vmax.f32 %v65_v40, %v67_v42  ;;  %v75_v57 = vmin.f32 %v68_v43, %v71_v48  ;;  %v76_v58 = vmax.f32 %v68_v43, %v71_v48  ;;  %v120_v37 = vld [vmem:[%s1145_s1 + $0x10] sm:$0xff]  ;;  %v130_v38 = vld [vmem:[%s1145_s1 + $0x60] sm:$0xff]  ;;  %v148_v39 = vld [vmem:[%s1141_s2 + $0x58] sm:$0xff] }
   0xd   :  { %v46_v56 = vadd.f32 %v43_v47, %v28_v23  ;;  %v81_v60 = vmin.f32 %v70_v45, %v72_v49  ;;  %v88_v2 = vshrl.u32 %v87_v15, 7  ;;  %v77_v11 = vmin.f32 %v65_v40, %v67_v42  ;;  %v496_v15 = vld [vmem:[%s1144_s3 + $0x20] sm:$0xff]  ;;  %v121_v41 = vld [vmem:[%s1145_s1 + $0x18] sm:$0xff]  ;;  %v131_v42 = vld [vmem:[%s1145_s1 + $0x68] sm:$0xff] }
   0xe   :  { %v45_v55 = vadd.f32 %v44_v33, %v42_v46  ;;  %178 = vperm.xlu0 %781, %v141_v50   ;;  %v79_v63 = vmax.f32 %v73_v52, %v75_v57  ;;  %v80_v0 = vmin.f32 %v74_v53, %v76_v58  ;;  %v82_v16 = vmax.f32 %v70_v45, %v72_v49  ;;  %v119_v33 = vld [vmem:[%s1145_s1 + $0x8] sm:$0xff]  ;;  %v500_v40 = vld [vmem:[%s1144_s3 + $0x40] sm:$0xff]  ;;  %v132_v46 = vld [vmem:[%s1145_s1 + $0x70] sm:$0xff] }
   0xf   :  { %v49_v62 = vadd.f32 %v46_v56, %v29_v17  ;;  %523 = vperm.xlu1 %782, %v494_v59   ;;  %v886_v12 = vsub.s32 0, %v88_v2  ;;  %vm116_vm4 = vcmask 1043456   ;;  %vm309_vm5 = vcmask 1044480   ;;  %v149_v43 = vld [vmem:[%s1141_s2 + $0x60] sm:$0xff]  ;;  %v501_v44 = vld [vmem:[%s1144_s3 + $0x48] sm:$0xff]  ;;  %v502_v48 = vld [vmem:[%s1144_s3 + $0x50] sm:$0xff] }
  0x10   :  { %v48_v61 = vadd.f32 %v47_v34, %v45_v55  ;;  %v83_v5 = vmax.f32 %v78_v54, %v80_v0  ;;  %v84_v6 = vmin.f32 %v79_v63, %v81_v60  ;;  %vm251_vm6 = vcmask 39936   ;;  %v129_v34 = vld [vmem:[%s1145_s1 + $0x58] sm:$0xff]  ;;  %v122_v45 = vld [vmem:[%s1145_s1 + $0x20] sm:$0xff]  ;;  %v150_v47 = vld [vmem:[%s1141_s2 + $0x68] sm:$0xff] }
  0x11   :  { %v52_v4 = vmul.f32 0.125, %v49_v62  ;;  %v96_v19 = vrot.slane %v77_v11, %v886_v12  ;;  %v108_v23 = vrot.slane %v82_v16, %v886_v12  ;;  %v123_v49 = vld [vmem:[%s1145_s1 + $0x28] sm:$0xff]  ;;  %v133_v50 = vld [vmem:[%s1145_s1 + $0x78] sm:$0xff]  ;;  %v124_v53 = vld [vmem:[%s1145_s1 + $0x30] sm:$0xff]  ;;  %vm642_vm7 = vcmask 1045504  }
  0x12   :  { %v51_v3 = vadd.f32 %v50_v51, %v48_v61  ;;  %183 = vperm.xlu0 %781, %v142_v1   ;;  %v85_v14 = vmin.f32 %v84_v6, %v83_v5  ;;  %v151_v51 = vld [vmem:[%s1141_s2 + $0x70] sm:$0xff]  ;;  %v503_v52 = vld [vmem:[%s1144_s3 + $0x58] sm:$0xff]  ;;  %v134_v54 = vld [vmem:[%s1145_s1 + $0x80] sm:$0xff] }
  0x13   :  { %v53_v9 = vmul.f32 %v52_v4, %v49_v62  ;;  %528 = vperm.xlu1 %782, %v495_v7   ;;  %v152_v55 = vld [vmem:[%s1141_s2 + $0x78] sm:$0xff]  ;;  %v504_v56 = vld [vmem:[%s1144_s3 + $0x60] sm:$0xff]  ;;  %v135_v58 = vld [vmem:[%s1145_s1 + $0x88] sm:$0xff] }
  0x14   :  { %v102_v21 = vrot.slane %v85_v14, %v886_v12  ;;  %v125_v57 = vld [vmem:[%s1145_s1 + $0x38] sm:$0xff]  ;;  %v153_v59 = vld [vmem:[%s1141_s2 + $0x80] sm:$0xff]  ;;  %v505_v60 = vld [vmem:[%s1144_s3 + $0x68] sm:$0xff] }
  0x15   :  { %v54_v13 = vsub.f32 %v51_v3, %v53_v9  ;;  %v126_v61 = vld [vmem:[%s1145_s1 + $0x40] sm:$0xff]  ;;  %v136_v62 = vld [vmem:[%s1145_s1 + $0x90] sm:$0x3f]  ;;  %v154_v63 = vld [vmem:[%s1141_s2 + $0x88] sm:$0xff] }
  0x16   :  { %188 = vperm.xlu0 %781, %v143_v10   ;;  %v506_v0 = vld [vmem:[%s1144_s3 + $0x70] sm:$0xff]  ;;  %v127_v1 = vld [vmem:[%s1145_s1 + $0x48] sm:$0xff]  ;;  %v507_v3 = vld [vmem:[%s1144_s3 + $0x78] sm:$0xff] }
  0x17   :  { %v56_v17 = vmul.f32 0.14285715, %v54_v13  ;;  %533 = vperm.xlu1 %782, %v496_v15   ;;  %v155_v2 = vld [vmem:[%s1141_s2 + $0x90] sm:$0x3f]  ;;  %v651_v5 = vld [vmem:[#allocation2] sm:$0x1] }
  0x18   :  { %v510_v6 = vld [vmem:[%s1144_s3 + $0x90] sm:$0x3f] }
  0x19   :  { %v90_v20 = vrot.slane %v56_v17, %v886_v12 }
  0x1a   :  { %193 = vperm.xlu0 %781, %v144_v18  }
  0x1b   :  { %v111_v24 = vsel %vm110_vm1, %v52_v4, %v90_v20  ;;  %538 = vperm.xlu1 %782, %v497_v22   ;;  %v508_v4 = vld [vmem:[%s1144_s3 + $0x80] sm:$0xff] }
  0x1c   :  { %v113_v26 = vsel %vm112_vm2, %v111_v24, %v96_v19 }
  0x1d   :  { %v115_v27 = vsel %vm114_vm3, %v113_v26, %v102_v21 }
  0x1e   :  { %v117_v30 = vsel %vm116_vm4, %v115_v27, %v108_v23  ;;  %198 = vperm.xlu0 %781, %v145_v25  }
  0x1f   :  { %718 = vmatpush3.msk.msra.mxu0 %vm309_vm5, %v117_v30  ;;  %777 = vmatpush3.msk.msra.mxu1 %vm309_vm5, %v117_v30 }
  0x20   :  { %720 = vmatmul.mubr.msk.f32.vlgmr.msra.gmra.mrb[0].mxu0 %vm251_vm6, %v118_v28  ;;  %750 = vmatmul.mubr.msk.f32.vlgmr.msra.gmra.mrb[0].mxu1 %vm251_vm6, %v128_v29 }
  0x21   :  { %722 = vmatprep.mubr.msk.f32.mxu0 %vm789_vm0, %v788_v8  ;;  %752 = vmatprep.mubr.msk.f32.mxu1 %vm789_vm0, %v788_v8 }
  0x22   :  { %203 = vperm.xlu0 %781, %v146_v31   ;;  %543 = vperm.xlu1 %782, %v498_v32  }
  0x24   :  { %723 = vmatmul.mubr.msk.f32.gmra.mrb[2].mxu0 %vm251_vm6, %v119_v33  ;;  %753 = vmatmul.mubr.msk.f32.gmra.mrb[2].mxu1 %vm251_vm6, %v129_v34 }
  0x25   :  { %725 = vmatprep.mubr.msk.f32.mxu0 %vm789_vm0, %v788_v8  ;;  %755 = vmatprep.mubr.msk.f32.mxu1 %vm789_vm0, %v788_v8 }
  0x26   :  { %208 = vperm.xlu0 %781, %v147_v35   ;;  %548 = vperm.xlu1 %782, %v499_v36  }
  0x28   :  { %726 = vmatmul.mubr.msk.f32.gmra.mrb[4].mxu0 %vm251_vm6, %v120_v37  ;;  %756 = vmatmul.mubr.msk.f32.gmra.mrb[4].mxu1 %vm251_vm6, %v130_v38 }
  0x29   :  { %728 = vmatprep.mubr.msk.f32.mxu0 %vm789_vm0, %v788_v8  ;;  %758 = vmatprep.mubr.msk.f32.mxu1 %vm789_vm0, %v788_v8 }
  0x2a   :  { %213 = vperm.xlu0 %781, %v148_v39   ;;  %553 = vperm.xlu1 %782, %v500_v40  }
  0x2c   :  { %729 = vmatmul.mubr.msk.f32.gmra.mrb[6].mxu0 %vm251_vm6, %v121_v41  ;;  %759 = vmatmul.mubr.msk.f32.gmra.mrb[6].mxu1 %vm251_vm6, %v131_v42 }
  0x2d   :  { %731 = vmatprep.mubr.msk.f32.mxu0 %vm789_vm0, %v788_v8  ;;  %761 = vmatprep.mubr.msk.f32.mxu1 %vm789_vm0, %v788_v8 }
  0x2e   :  { %218 = vperm.xlu0 %781, %v149_v43   ;;  %558 = vperm.xlu1 %782, %v501_v44  }
  0x30   :  { %732 = vmatmul.mubr.msk.f32.gmra.mrb[8].mxu0 %vm251_vm6, %v122_v45  ;;  %762 = vmatmul.mubr.msk.f32.gmra.mrb[8].mxu1 %vm251_vm6, %v132_v46 }
  0x31   :  { %734 = vmatprep.mubr.msk.f32.mxu0 %vm789_vm0, %v788_v8  ;;  %764 = vmatprep.mubr.msk.f32.mxu1 %vm789_vm0, %v788_v8 }
  0x32   :  { %223 = vperm.xlu0 %781, %v150_v47   ;;  %563 = vperm.xlu1 %782, %v502_v48  }
  0x34   :  { %735 = vmatmul.mubr.msk.f32.gmra.mrb[10].mxu0 %vm251_vm6, %v123_v49  ;;  %765 = vmatmul.mubr.msk.f32.gmra.mrb[10].mxu1 %vm251_vm6, %v133_v50 }
  0x35   :  { %737 = vmatprep.mubr.msk.f32.mxu0 %vm789_vm0, %v788_v8  ;;  %767 = vmatprep.mubr.msk.f32.mxu1 %vm789_vm0, %v788_v8 }
  0x36   :  { %228 = vperm.xlu0 %781, %v151_v51   ;;  %568 = vperm.xlu1 %782, %v503_v52  }
  0x38   :  { %738 = vmatmul.mubr.msk.f32.gmra.mrb[12].mxu0 %vm251_vm6, %v124_v53  ;;  %768 = vmatmul.mubr.msk.f32.gmra.mrb[12].mxu1 %vm251_vm6, %v134_v54 }
  0x39   :  { %740 = vmatprep.mubr.msk.f32.mxu0 %vm789_vm0, %v788_v8  ;;  %770 = vmatprep.mubr.msk.f32.mxu1 %vm789_vm0, %v788_v8 }
  0x3a   :  { %233 = vperm.xlu0 %781, %v152_v55   ;;  %573 = vperm.xlu1 %782, %v504_v56  }
  0x3c   :  { %741 = vmatmul.mubr.msk.f32.gmra.mrb[14].mxu0 %vm251_vm6, %v125_v57  ;;  %771 = vmatmul.mubr.msk.f32.gmra.mrb[14].mxu1 %vm251_vm6, %v135_v58 }
  0x3d   :  { %743 = vmatprep.mubr.msk.f32.mxu0 %vm789_vm0, %v788_v8  ;;  %773 = vmatprep.mubr.msk.f32.mxu1 %vm789_vm0, %v788_v8 }
  0x3e   :  { %238 = vperm.xlu0 %781, %v153_v59   ;;  %578 = vperm.xlu1 %782, %v505_v60  }
  0x40   :  { %744 = vmatmul.mubr.msk.f32.gmra.mrb[16].mxu0 %vm251_vm6, %v126_v61  ;;  %774 = vmatmul.mubr.msk.f32.gmra.mrb[16].mxu1 %vm251_vm6, %v136_v62 }
  0x41   :  { %746 = vmatprep.mubr.msk.f32.mxu0 %vm789_vm0, %v788_v8  ;;  %v509_v8 = vld [vmem:[%s1144_s3 + $0x88] sm:$0xff] }
  0x42   :  { %243 = vperm.xlu0 %781, %v154_v63   ;;  %583 = vperm.xlu1 %782, %v506_v0  }
  0x44   :  { %747 = vmatmul.mubr.msk.f32.gmra.mrb[18].mxu0 %vm251_vm6, %v127_v1 }
  0x46   :  { %248 = vperm.xlu0 %781, %v155_v2   ;;  %588 = vperm.xlu1 %782, %v507_v3  }
  0x4a   :  { %598 = vperm.xlu0 %781, %v509_v8   ;;  %593 = vperm.xlu1 %782, %v508_v4  }
  0x4e   :  { %654 = vperm.xlu0 %781, %v651_v5   ;;  %603 = vperm.xlu1 %782, %v510_v6  }
  0x81   :  { %v159_v7 = vpop.permute.xlu0 %158  ;;  %v169_v9 = vpop.permute.xlu1 %168 }
  0x85   :  { %v164_v10 = vpop.permute.xlu0 %163 }
  0x86   :  { %v174_v11 = vpop.permute.xlu1 %173 }
  0x89   :  { %v514_v13 = vpop.permute.xlu0 %513 }
  0x8a   :  { %v519_v14 = vpop.permute.xlu1 %518 }
  0x8d   :  { %v179_v15 = vpop.permute.xlu0 %178 }
  0x8e   :  { %v524_v16 = vpop.permute.xlu1 %523 }
  0x91   :  { %v184_v17 = vpop.permute.xlu0 %183 }
  0x92   :  { %v529_v18 = vpop.permute.xlu1 %528 }
  0x95   :  { %v1083_v19 = vpop.permute.xlu0 %188 }
  0x96   :  { %v534_v20 = vpop.permute.xlu1 %533 }
  0x99   :  { %v1085_v21 = vpop.permute.xlu0 %193 }
  0x9a   :  { %v539_v22 = vpop.permute.xlu1 %538 }
  0x9d   :  { %v1087_v23 = vpop.permute.xlu0 %198 }
  0xa1   :  { %v1089_v24 = vpop.permute.xlu1 %543  ;;  %v1091_v25 = vpop.permute.xlu0 %203 }
  0xa5   :  { %v1093_v26 = vpop.permute.xlu1 %548  ;;  %v1095_v27 = vpop.permute.xlu0 %208 }
  0xa9   :  { %v1097_v28 = vpop.permute.xlu1 %553  ;;  %v1099_v29 = vpop.permute.xlu0 %213 }
  0xad   :  { %v1101_v30 = vpop.permute.xlu1 %558  ;;  %v1105_v36 = vpop.permute.xlu0 %218 }
  0xb1   :  { %v1109_v43 = vpop.permute.xlu1 %563  ;;  %v1113_v52 = vpop.permute.xlu0 %223 }
  0xb5   :  { %v1117_v61 = vpop.permute.xlu1 %568  ;;  %v229_v5 = vpop.permute.xlu0 %228 }
  0xf3   :  { %v379_v31 = vpop.f32.mrb[0].mxu0  ;;  %v1103_v32 = vpop.f32.mrb[0].mxu1 }
  0xf4   :  { %v380_v33 = vadd.f32 %v379_v31, %v159_v7  ;;  %v721_v34 = vpop.f32.mrb[1].mxu0  ;;  %v751_v35 = vpop.f32.mrb[1].mxu1 }
  0xf5   :  { %v574_v31 = vpop.permute.xlu1 %573 }
  0xf6   :  { %v473_v39 = vmax.f32 %v380_v33, 0.0 }
  0xf7   :  { %v384_v37 = vpop.f32.mrb[2].mxu0  ;;  %v1107_v38 = vpop.f32.mrb[2].mxu1 }
  0xf8   :  { %v385_v40 = vadd.f32 %v384_v37, %v164_v10  ;;  %v724_v41 = vpop.f32.mrb[3].mxu0  ;;  %v754_v42 = vpop.f32.mrb[3].mxu1  ;;  %v606_v47 = vmul.f32 %v514_v13, %v473_v39 }
  0xf9   :  { %v234_v41 = vpop.permute.xlu0 %233 }
  0xfa   :  { %v474_v44 = vmax.f32 %v385_v40, 0.0 }
  0xfb   :  { %v389_v45 = vpop.f32.mrb[4].mxu0  ;;  %v1111_v46 = vpop.f32.mrb[4].mxu1 }
  0xfc   :  { %v607_v48 = vmul.f32 %v519_v14, %v474_v44  ;;  %v390_v49 = vadd.f32 %v389_v45, %v169_v9  ;;  %v727_v50 = vpop.f32.mrb[5].mxu0  ;;  %v757_v51 = vpop.f32.mrb[5].mxu1 }
  0xfd   :  { %v579_v50 = vpop.permute.xlu1 %578 }
  0xfe   :  { %v625_v53 = vadd.f32 %v607_v48, %v606_v47  ;;  %v475_v54 = vmax.f32 %v390_v49, 0.0 }
  0xff   :  { %v394_v55 = vpop.f32.mrb[6].mxu0  ;;  %v1115_v56 = vpop.f32.mrb[6].mxu1 }
 0x100   :  { %v608_v57 = vmul.f32 %v524_v16, %v475_v54  ;;  %v395_v58 = vadd.f32 %v394_v55, %v174_v11  ;;  %v730_v59 = vpop.f32.mrb[7].mxu0  ;;  %v760_v60 = vpop.f32.mrb[7].mxu1 }
 0x101   :  { %v239_v59 = vpop.permute.xlu0 %238  ;;  %v430_v60 = vadd.f32 %v1103_v32, %v1095_v27  ;;  %v445_v32 = vadd.f32 %v1115_v56, %v1113_v52 }
 0x102   :  { %v626_v62 = vadd.f32 %v625_v53, %v608_v57  ;;  %v476_v63 = vmax.f32 %v395_v58, 0.0 }
 0x103   :  { %v399_v0 = vpop.f32.mrb[8].mxu0  ;;  %v449_v1 = vpop.f32.mrb[8].mxu1 }
 0x104   :  { %v609_v2 = vmul.f32 %v529_v18, %v476_v63  ;;  %v400_v3 = vadd.f32 %v399_v0, %v179_v15  ;;  %v733_v8 = vpop.f32.mrb[9].mxu0  ;;  %v763_v4 = vpop.f32.mrb[9].mxu1  ;;  %v435_v0 = vadd.f32 %v1107_v38, %v1099_v29  ;;  %v450_v38 = vadd.f32 %v449_v1, %v229_v5 }
 0x105   :  { %v584_v63 = vpop.permute.xlu1 %583  ;;  %v483_v8 = vmax.f32 %v430_v60, 0.0 }
 0x106   :  { %v627_v6 = vadd.f32 %v626_v62, %v609_v2  ;;  %v477_v7 = vmax.f32 %v400_v3, 0.0  ;;  %v484_v27 = vmax.f32 %v435_v0, 0.0 }
 0x107   :  { %v404_v9 = vpop.f32.mrb[10].mxu0  ;;  %v454_v10 = vpop.f32.mrb[10].mxu1  ;;  %v616_v29 = vmul.f32 %v1109_v43, %v483_v8 }
 0x108   :  { %v610_v13 = vmul.f32 %v534_v20, %v477_v7  ;;  %v405_v14 = vadd.f32 %v404_v9, %v184_v17  ;;  %v736_v11 = vpop.f32.mrb[11].mxu0  ;;  %v766_v16 = vpop.f32.mrb[11].mxu1 }
 0x109   :  { %v244_v7 = vpop.permute.xlu0 %243  ;;  %v486_v11 = vmax.f32 %v445_v32, 0.0  ;;  %v455_v16 = vadd.f32 %v454_v10, %v234_v41 }
 0x10a   :  { %v628_v33 = vadd.f32 %v627_v6, %v610_v13  ;;  %v478_v34 = vmax.f32 %v405_v14, 0.0  ;;  %v589_v13 = vpop.permute.xlu1 %588  ;;  %v617_v14 = vmul.f32 %v1117_v61, %v484_v27 }
 0x10b   :  { %v409_v35 = vpop.f32.mrb[12].mxu0  ;;  %v459_v37 = vpop.f32.mrb[12].mxu1  ;;  %v619_v56 = vmul.f32 %v579_v50, %v486_v11 }
 0x10c   :  { %v611_v39 = vmul.f32 %v539_v22, %v478_v34  ;;  %v410_v18 = vadd.f32 %v409_v35, %v1083_v19  ;;  %v739_v15 = vpop.f32.mrb[13].mxu0  ;;  %v769_v40 = vpop.f32.mrb[13].mxu1  ;;  %v487_v34 = vmax.f32 %v450_v38, 0.0  ;;  %v460_v35 = vadd.f32 %v459_v37, %v239_v59 }
 0x10e   :  { %v629_v42 = vadd.f32 %v628_v33, %v611_v39  ;;  %v479_v44 = vmax.f32 %v410_v18, 0.0  ;;  %v594_v52 = vpop.permute.xlu1 %593  ;;  %v620_v43 = vmul.f32 %v584_v63, %v487_v34 }
 0x10f   :  { %v414_v45 = vpop.f32.mrb[14].mxu0  ;;  %v464_v47 = vpop.f32.mrb[14].mxu1 }
 0x110   :  { %v612_v20 = vmul.f32 %v1089_v24, %v479_v44  ;;  %v415_v17 = vadd.f32 %v414_v45, %v1085_v21  ;;  %v742_v48 = vpop.f32.mrb[15].mxu0  ;;  %v772_v49 = vpop.f32.mrb[15].mxu1  ;;  %v465_v15 = vadd.f32 %v464_v47, %v244_v7 }
 0x112   :  { %v630_v51 = vadd.f32 %v629_v42, %v612_v20  ;;  %v480_v53 = vmax.f32 %v415_v17, 0.0  ;;  %v489_v42 = vmax.f32 %v460_v35, 0.0  ;;  %v490_v61 = vmax.f32 %v465_v15, 0.0  ;;  %v604_v10 = vpop.permute.xlu1 %603 }
 0x113   :  { %v419_v54 = vpop.f32.mrb[16].mxu0  ;;  %v469_v22 = vpop.f32.mrb[16].mxu1 }
 0x114   :  { %v613_v19 = vmul.f32 %v1093_v26, %v480_v53  ;;  %v420_v55 = vadd.f32 %v419_v54, %v1087_v23  ;;  %v745_v57 = vpop.f32.mrb[17].mxu0  ;;  %v775_v58 = vpop.f32.mrb[17].mxu1  ;;  %v440_v23 = vadd.f32 %v1111_v46, %v1105_v36  ;;  %v622_v41 = vmul.f32 %v594_v52, %v489_v42 }
 0x115   :  { %v249_v46 = vpop.permute.xlu0 %248 }
 0x116   :  { %v631_v24 = vadd.f32 %v630_v51, %v613_v19  ;;  %v481_v62 = vmax.f32 %v420_v55, 0.0  ;;  %v470_v18 = vadd.f32 %v469_v22, %v249_v46 }
 0x117   :  { %v424_v21 = vpop.f32.mrb[18].mxu0 }
 0x118   :  { %v614_v2 = vmul.f32 %v1097_v28, %v481_v62  ;;  %v425_v3 = vadd.f32 %v424_v21, %v1091_v25  ;;  %v748_v26 = vpop.f32.mrb[19].mxu0  ;;  %v485_v28 = vmax.f32 %v440_v23, 0.0  ;;  %v491_v5 = vmax.f32 %v470_v18, 0.0 }
 0x11a   :  { %v632_v4 = vadd.f32 %v631_v24, %v614_v2  ;;  %v482_v6 = vmax.f32 %v425_v3, 0.0  ;;  %v618_v33 = vmul.f32 %v574_v31, %v485_v28  ;;  %v599_v31 = vpop.permute.xlu0 %598  ;;  %v624_v17 = vmul.f32 %v604_v10, %v491_v5 }
 0x11b   :  { %v623_v37 = vmul.f32 %v599_v31, %v490_v61 }
 0x11c   :  { %v615_v9 = vmul.f32 %v1101_v30, %v482_v6  ;;  %v488_v30 = vmax.f32 %v455_v16, 0.0  ;;  %v643_v50 = vsel %vm642_vm7, %v624_v17, 0.0 }
 0x11e   :  { %v633_v25 = vadd.f32 %v632_v4, %v615_v9  ;;  %v621_v44 = vmul.f32 %v589_v13, %v488_v30  ;;  %v655_v19 = vpop.permute.xlu0 %654 }
 0x11f   :  { %v660_v57 = vrot.slane %v655_v19, %v886_v12 }
 0x120   :  { %v634_v36 = vadd.f32 %v633_v25, %v616_v29 }
 0x122   :  { %v635_v39 = vadd.f32 %v634_v36, %v617_v14 }
 0x124   :  { %v636_v40 = vadd.f32 %v635_v39, %v618_v33 }
 0x126   :  { %v637_v1 = vadd.f32 %v636_v40, %v619_v56 }
 0x128   :  { %v638_v45 = vadd.f32 %v637_v1, %v620_v43 }
 0x12a   :  { %v639_v20 = vadd.f32 %v638_v45, %v621_v44 }
 0x12c   :  { %v640_v48 = vadd.f32 %v639_v20, %v622_v41 }
 0x12e   :  { %v641_v49 = vadd.f32 %v640_v48, %v623_v37 }
 0x130   :  { %v644_v51 = vadd.f32 %v643_v50, %v641_v49 }
 0x132   :  { %v645_v47 = vrot.slane %v644_v51, 4 }
 0x134   :  { %v646_v53 = vadd.f32 %v645_v47, %v644_v51 }
 0x136   :  { %v647_v54 = vrot.slane %v646_v53, 2 }
 0x138   :  { %v648_v22 = vadd.f32 %v647_v54, %v646_v53 }
 0x13a   :  { %v649_v55 = vrot.slane %v648_v22, 1 }
 0x13c   :  { %v650_v58 = vadd.f32 %v649_v55, %v648_v22 }
 0x13e   :  { %v661_v59 = vadd.f32 %v660_v57, %v650_v58 }
 0x140   :  { %v662_v60 = vand.u32 2147483647, %v661_v59  ;;  %vm666_vm8 = vcmp.ge.f32.partialorder %v661_v59, 0.0 }
 0x142   :  { %v663_v24 = vsub.f32 0.0, %v662_v60 }
 0x144   :  { %v664_v62 = vmul.f32 1.442695, %v663_v24 }
 0x146   :  { %783 = vpow2.f32 %v664_v62 }
 0x150   :  { %v784_v21 = vpop.eup %783 }
 0x151   :  { %v667_v63 = vadd.f32 1.0, %v784_v21 }
 0x153   :  { %785 = vrcp.f32 %v667_v63 }
 0x15d   :  { %v786_v0 = vpop.eup %785 }
 0x15e   :  { %v670_v2 = vmul.f32 %v786_v0, %v784_v21 }
 0x160   :  { %v671_v3 = vsel %vm666_vm8, %v786_v0, %v670_v2 }
 0x161   :  { %672 = vst [vmem:[%s1146_s5] sm:$0x1] %v671_v3 }

</bundles_post_ra>
